<compile_context>
chip_gen: v7x
topology: tpu7x:2x2x1
jax: 0.10.0
libtpu: 0.0.40
codegen_flags: <defaults>
</compile_context>

<pallas_src>
from typing import List, NamedTuple, Optional, Tuple

import jax
import jax.numpy as jnp
from jax.experimental import pallas as pl
from jax.experimental.pallas import tpu as pltpu


OUT_PAD = 128  # lane-dense padded output width; real scores occupy columns 0..5


class FeaturedPoints(NamedTuple):
    x: jnp.ndarray  # [N, 3] coordinates
    f: jnp.ndarray  # [N, C] features


def _full_spec(shape):
    # whole-array block (block_shape == array shape is always legal on TPU)
    return pl.BlockSpec(shape, lambda: tuple(0 for _ in shape))


# ----------------------------------------------------------------------------------
# Single fused kernel: key/query point encoders -> mean pool -> MLP score head
# ----------------------------------------------------------------------------------
def _fused_forward_kernel(kf_in_ref, qf_in_ref, ts_ref, time_ref,
                          wk_ref, bk_ref, wq_ref, bq_ref,
                          w1_ref, b1_ref, w2_ref, b2_ref,
                          out_ref, *debug_refs):
    # ---- point-feature encoders: relu(f @ W + b) ----
    kf = jnp.maximum(
        jnp.dot(kf_in_ref[...], wk_ref[...], preferred_element_type=jnp.float32)
        + bk_ref[...], 0.0)                                        # [NK, H]
    qf = jnp.maximum(
        jnp.dot(qf_in_ref[...], wq_ref[...], preferred_element_type=jnp.float32)
        + bq_ref[...], 0.0)                                        # [NQ, H]

    if debug_refs:  # debug=True path only: also materialize the encoded features
        kf_out_ref, qf_out_ref = debug_refs
        kf_out_ref[...] = kf
        qf_out_ref[...] = qf

    # ---- mean pool over points (stays in VMEM; no HBM round-trip) ----
    k_pool = jnp.mean(kf, axis=0, keepdims=True)                   # [1, H]
    q_pool = jnp.mean(qf, axis=0, keepdims=True)                   # [1, H]

    # ---- first MLP layer: one matmul on the concatenated row ----
    ts = ts_ref[...]                                               # [B, 7]
    b = ts.shape[0]
    sqrt_t = jnp.sqrt(time_ref[...])                               # [B, 1]
    x = jnp.concatenate(
        [ts, sqrt_t,
         jnp.broadcast_to(k_pool, (b, k_pool.shape[1])),
         jnp.broadcast_to(q_pool, (b, q_pool.shape[1]))],
        axis=-1)                                                   # [B, 8 + 2H]
    h = jnp.maximum(
        jnp.dot(x, w1_ref[...], preferred_element_type=jnp.float32) + b1_ref[...],
        0.0)                                                       # [B, H]

    # ---- output layer: lane-dense (B, OUT_PAD); ang/lin mults are baked into w2/b2 ----
    out_ref[...] = (jnp.dot(h, w2_ref[...], preferred_element_type=jnp.float32)
                    + b2_ref[...])                                 # [B, OUT_PAD]


def fused_forward_pallas(key_f, query_f, Ts, time_col, params, *, debug=False):
    b = Ts.shape[0]
    nk = key_f.shape[0]
    nq = query_f.shape[0]
    hidden = params["wk"].shape[1]

    args = (key_f, query_f, Ts, time_col,
            params["wk"], params["bk"], params["wq"], params["bq"],
            params["w1"], params["b1"], params["w2p"], params["b2p"])

    out_shape = [jax.ShapeDtypeStruct((b, OUT_PAD), jnp.float32)]
    out_specs = [_full_spec((b, OUT_PAD))]
    if debug:
        out_shape += [jax.ShapeDtypeStruct((nk, hidden), jnp.float32),
                      jax.ShapeDtypeStruct((nq, hidden), jnp.float32)]
        out_specs += [_full_spec((nk, hidden)), _full_spec((nq, hidden))]

    return pl.pallas_call(
        _fused_forward_kernel,
        out_shape=tuple(out_shape),
        grid=(),
        in_specs=[_full_spec(a.shape) for a in args],
        out_specs=tuple(out_specs),
        compiler_params=pltpu.CompilerParams(vmem_limit_bytes=32 * 1024 * 1024),
    )(*args)


# ----------------------------------------------------------------------------------
# Concrete ScoreModelBase (JAX / Pallas)
# ----------------------------------------------------------------------------------
class ScoreModelBasePallas:
    def __init__(self, feat_dim: int = 32, hidden: int = 32,
                 lin_mult: float = 1.0, ang_mult: float = 1.0,
                 key: jax.Array = jax.random.PRNGKey(0)):
        self.lin_mult = float(lin_mult)
        self.ang_mult = float(ang_mult)
        # buffers registered in ScoreModelBase.__init__ (used by sample(), not forward())
        self.q_indices = jnp.array([[1, 2, 3], [0, 3, 2], [3, 0, 1], [2, 1, 0]],
                                   dtype=jnp.int32)
        self.q_factor = jnp.array([[-0.5, -0.5, -0.5], [0.5, -0.5, 0.5],
                                   [0.5, 0.5, -0.5], [-0.5, 0.5, 0.5]],
                                  dtype=jnp.float32)

        ks = jax.random.split(key, 9)
        s = 0.1
        raw = {
            "wk": s * jax.random.normal(ks[0], (feat_dim, hidden), jnp.float32),
            "bk": s * jax.random.normal(ks[1], (1, hidden), jnp.float32),
            "wq": s * jax.random.normal(ks[2], (feat_dim, hidden), jnp.float32),
            "bq": s * jax.random.normal(ks[3], (1, hidden), jnp.float32),
            "w1_ts": s * jax.random.normal(ks[4], (7, hidden), jnp.float32),
            "w1_t": s * jax.random.normal(ks[5], (1, hidden), jnp.float32),
            "w1_k": s * jax.random.normal(ks[6], (hidden, hidden), jnp.float32),
            "w1_q": s * jax.random.normal(ks[7], (hidden, hidden), jnp.float32),
            "b1": jnp.zeros((1, hidden), jnp.float32),
            "w2": s * jax.random.normal(ks[8], (hidden, 6), jnp.float32),
            "b2": jnp.zeros((1, 6), jnp.float32),
        }
        self.raw = raw  # kept for the pure-JAX reference

        # Fused / padded parameters for the single-kernel forward path:
        #  * W1 = concat of the four first-layer weights along the contraction dim
        #    (matches the in-kernel concat order [Ts | sqrt(t) | k_pool | q_pool]).
        #  * w2/b2 zero-padded to OUT_PAD lanes with ang_mult / lin_mult baked in
        #    (cols 0..2 angular, cols 3..5 linear) -> lane-dense output, zero runtime cost.
        w1 = jnp.concatenate([raw["w1_ts"], raw["w1_t"], raw["w1_k"], raw["w1_q"]],
                             axis=0)                                 # [8 + 2H, H]
        mult = jnp.concatenate([jnp.full((3,), self.ang_mult, jnp.float32),
                                jnp.full((3,), self.lin_mult, jnp.float32)])
        w2p = jnp.zeros((hidden, OUT_PAD), jnp.float32).at[:, :6].set(raw["w2"] * mult[None, :])
        b2p = jnp.zeros((1, OUT_PAD), jnp.float32).at[:, :6].set(raw["b2"] * mult[None, :])

        self.params = {
            "wk": raw["wk"], "bk": raw["bk"], "wq": raw["wq"], "bq": raw["bq"],
            "w1": w1, "b1": raw["b1"], "w2p": w2p, "b2p": b2p,
        }

    # ---- forward (mirrors ScoreModelBase.forward) -----------------------------
    # TODO(synk): get_key_pcd_multiscale / get_query_pcd / score_head are abstract in the
    # reference; the concrete Linear + mean-pool + MLP head here is synthetic and is fused
    # into a single Pallas kernel (the hot path never writes encoded features to HBM).
    def forward(self, Ts, time, key_pcd: FeaturedPoints, query_pcd: FeaturedPoints,
                debug: bool = False
                ) -> Tuple[Tuple[jnp.ndarray, jnp.ndarray],
                           Optional[Tuple[List[FeaturedPoints], FeaturedPoints]]]:
        time_col = time.reshape(-1, 1).astype(jnp.float32)
        outs = fused_forward_pallas(key_pcd.f.astype(jnp.float32),
                                    query_pcd.f.astype(jnp.float32),
                                    Ts.astype(jnp.float32), time_col,
                                    self.params, debug=debug)
        if debug:
            out, kf, qf = outs
            debug_output = ([FeaturedPoints(x=key_pcd.x, f=kf)],
                            FeaturedPoints(x=query_pcd.x, f=qf))
        else:
            out = outs[0]
            debug_output = None

        ang_score = out[:, 0:3]
        lin_score = out[:, 3:6]
        return (ang_score, lin_score), debug_output


# ----------------------------------------------------------------------------------
# pure-JAX reference of the same forward (for verification)
# ----------------------------------------------------------------------------------
def forward_ref(model, Ts, time, key_pcd, query_pcd):
    p = model.raw
    kf = jnp.maximum(key_pcd.f @ p["wk"] + p["bk"], 0.0)
    qf = jnp.maximum(query_pcd.f @ p["wq"] + p["bq"], 0.0)
    k_pool = jnp.mean(kf, axis=0, keepdims=True)
    q_pool = jnp.mean(qf, axis=0, keepdims=True)
    sqrt_t = jnp.sqrt(time)[:, None]
    h = jnp.maximum(Ts @ p["w1_ts"] + sqrt_t @ p["w1_t"] + k_pool @ p["w1_k"]
                    + q_pool @ p["w1_q"] + p["b1"], 0.0)
    out = h @ p["w2"] + p["b2"]
    return (out[:, 0:3] * model.ang_mult, out[:, 3:6] * model.lin_mult, kf, qf)


if __name__ == "__main__":
    B, NK, NQ, C, H = 2, 16, 8, 32, 32
    root = jax.random.PRNGKey(0)
    k_model, k_ts, k_tr, k_time, k_kx, k_kf, k_qx, k_qf = jax.random.split(root, 8)

    model = ScoreModelBasePallas(feat_dim=C, hidden=H, lin_mult=2.0, ang_mult=0.5,
                                 key=k_model)

    # poses: normalized quaternion + translation -> [B, 7]
    quat = jax.random.normal(k_ts, (B, 4), jnp.float32)
    quat = quat / jnp.linalg.norm(quat, axis=-1, keepdims=True)
    trans = 0.5 * jax.random.normal(k_tr, (B, 3), jnp.float32)
    Ts = jnp.concatenate([quat, trans], axis=-1)                      # [B, 7]
    time = jax.random.uniform(k_time, (B,), jnp.float32, 0.01, 1.0)   # [B]

    key_pcd = FeaturedPoints(x=jax.random.normal(k_kx, (NK, 3), jnp.float32),
                             f=jax.random.normal(k_kf, (NK, C), jnp.float32))
    query_pcd = FeaturedPoints(x=jax.random.normal(k_qx, (NQ, 3), jnp.float32),
                               f=jax.random.normal(k_qf, (NQ, C), jnp.float32))

    # --- main (non-debug) path: single fused kernel, no feature write-back ---
    (ang_score, lin_score), dbg = model.forward(Ts, time, key_pcd, query_pcd, debug=False)
    ang_score = jax.block_until_ready(ang_score)
    lin_score = jax.block_until_ready(lin_score)

    ang_ref, lin_ref, kf_ref, qf_ref = forward_ref(model, Ts, time, key_pcd, query_pcd)
    assert ang_score.shape == (B, 3) and lin_score.shape == (B, 3)
    assert dbg is None
    assert jnp.allclose(ang_score, ang_ref, rtol=1e-3, atol=1e-4)
    assert jnp.allclose(lin_score, lin_ref, rtol=1e-3, atol=1e-4)

    # --- debug path: same fused kernel, extra outputs for encoded features ---
    (ang_d, lin_d), dbg = model.forward(Ts, time, key_pcd, query_pcd, debug=True)
    ang_d = jax.block_until_ready(ang_d)
    assert dbg is not None
    key_ms, query_fp = dbg
    assert jnp.allclose(ang_d, ang_ref, rtol=1e-3, atol=1e-4)
    assert jnp.allclose(lin_d, lin_ref, rtol=1e-3, atol=1e-4)
    assert jnp.allclose(key_ms[0].f, kf_ref, rtol=1e-3, atol=1e-4)
    assert jnp.allclose(query_fp.f, qf_ref, rtol=1e-3, atol=1e-4)

    print("KERNEL_OK")
</pallas_src>

<mosaic_0001>
module attributes {stable_mosaic.version = 11 : i64} {
  func.func @_fused_forward_kernel(%arg0: memref<16x32xf32, #tpu.memory_space<vmem>>, %arg1: memref<8x32xf32, #tpu.memory_space<vmem>>, %arg2: memref<2x7xf32, #tpu.memory_space<vmem>>, %arg3: memref<2x1xf32, #tpu.memory_space<vmem>>, %arg4: memref<32x32xf32, #tpu.memory_space<vmem>>, %arg5: memref<1x32xf32, #tpu.memory_space<vmem>>, %arg6: memref<32x32xf32, #tpu.memory_space<vmem>>, %arg7: memref<1x32xf32, #tpu.memory_space<vmem>>, %arg8: memref<72x32xf32, #tpu.memory_space<vmem>>, %arg9: memref<1x32xf32, #tpu.memory_space<vmem>>, %arg10: memref<32x128xf32, #tpu.memory_space<vmem>>, %arg11: memref<1x128xf32, #tpu.memory_space<vmem>>, %arg12: memref<2x128xf32, #tpu.memory_space<vmem>>) attributes {dimension_semantics = [], scalar_prefetch = 0 : i64, scratch_operands = 0 : i64, tpu.core_type = #tpu.core_type<tc>} {
    %c0 = arith.constant 0 : index
    %c0_0 = arith.constant 0 : index
    %0 = vector.load %arg0[%c0, %c0_0] : memref<16x32xf32, #tpu.memory_space<vmem>>, vector<16x32xf32>
    %c0_1 = arith.constant 0 : index
    %c0_2 = arith.constant 0 : index
    %1 = vector.load %arg4[%c0_1, %c0_2] : memref<32x32xf32, #tpu.memory_space<vmem>>, vector<32x32xf32>
    %cst = arith.constant dense<0.000000e+00> : vector<16x32xf32>
    %2 = tpu.matmul %0, %1, %cst {dimension_numbers = #tpu.dot_dimension_numbers<[1], [0], [0], [1], [0, 0, 1, 1], [], []>} : vector<16x32xf32>, vector<32x32xf32>, vector<16x32xf32> -> vector<16x32xf32>
    %c0_3 = arith.constant 0 : index
    %c0_4 = arith.constant 0 : index
    %3 = vector.load %arg5[%c0_3, %c0_4] : memref<1x32xf32, #tpu.memory_space<vmem>>, vector<1x32xf32>
    %4 = vector.broadcast %3 : vector<1x32xf32> to vector<16x32xf32>
    %5 = arith.addf %2, %4 : vector<16x32xf32>
    %cst_5 = arith.constant 0.000000e+00 : f32
    %6 = vector.broadcast %cst_5 : f32 to vector<16x32xf32>
    %7 = arith.maximumf %5, %6 : vector<16x32xf32>
    %c0_6 = arith.constant 0 : index
    %c0_7 = arith.constant 0 : index
    %8 = vector.load %arg1[%c0_6, %c0_7] : memref<8x32xf32, #tpu.memory_space<vmem>>, vector<8x32xf32>
    %c0_8 = arith.constant 0 : index
    %c0_9 = arith.constant 0 : index
    %9 = vector.load %arg6[%c0_8, %c0_9] : memref<32x32xf32, #tpu.memory_space<vmem>>, vector<32x32xf32>
    %cst_10 = arith.constant dense<0.000000e+00> : vector<8x32xf32>
    %10 = tpu.matmul %8, %9, %cst_10 {dimension_numbers = #tpu.dot_dimension_numbers<[1], [0], [0], [1], [0, 0, 1, 1], [], []>} : vector<8x32xf32>, vector<32x32xf32>, vector<8x32xf32> -> vector<8x32xf32>
    %c0_11 = arith.constant 0 : index
    %c0_12 = arith.constant 0 : index
    %11 = vector.load %arg7[%c0_11, %c0_12] : memref<1x32xf32, #tpu.memory_space<vmem>>, vector<1x32xf32>
    %12 = vector.broadcast %11 : vector<1x32xf32> to vector<8x32xf32>
    %13 = arith.addf %10, %12 : vector<8x32xf32>
    %cst_13 = arith.constant 0.000000e+00 : f32
    %14 = vector.broadcast %cst_13 : f32 to vector<8x32xf32>
    %15 = arith.maximumf %13, %14 : vector<8x32xf32>
    %cst_14 = arith.constant dense<0.000000e+00> : vector<32xf32>
    %16 = vector.multi_reduction <add>, %7, %cst_14 [0] : vector<16x32xf32> to vector<32xf32>
    %17 = vector.shape_cast %16 : vector<32xf32> to vector<1x32xf32>
    %cst_15 = arith.constant 1.600000e+01 : f32
    %18 = vector.broadcast %cst_15 : f32 to vector<1x32xf32>
    %19 = arith.divf %17, %18 : vector<1x32xf32>
    %cst_16 = arith.constant dense<0.000000e+00> : vector<32xf32>
    %20 = vector.multi_reduction <add>, %15, %cst_16 [0] : vector<8x32xf32> to vector<32xf32>
    %21 = vector.shape_cast %20 : vector<32xf32> to vector<1x32xf32>
    %cst_17 = arith.constant 8.000000e+00 : f32
    %22 = vector.broadcast %cst_17 : f32 to vector<1x32xf32>
    %23 = arith.divf %21, %22 : vector<1x32xf32>
    %c0_18 = arith.constant 0 : index
    %c0_19 = arith.constant 0 : index
    %24 = vector.load %arg2[%c0_18, %c0_19] : memref<2x7xf32, #tpu.memory_space<vmem>>, vector<2x7xf32>
    %c0_20 = arith.constant 0 : index
    %c0_21 = arith.constant 0 : index
    %25 = vector.load %arg3[%c0_20, %c0_21] : memref<2x1xf32, #tpu.memory_space<vmem>>, vector<2x1xf32>
    %26 = math.sqrt %25 : vector<2x1xf32>
    %27 = vector.shape_cast %19 : vector<1x32xf32> to vector<1x32xf32>
    %28 = vector.broadcast %27 : vector<1x32xf32> to vector<2x32xf32>
    %29 = vector.shape_cast %23 : vector<1x32xf32> to vector<1x32xf32>
    %30 = vector.broadcast %29 : vector<1x32xf32> to vector<2x32xf32>
    %31 = tpu.concatenate %24, %26, %28, %30 in 1 : vector<2x7xf32>, vector<2x1xf32>, vector<2x32xf32>, vector<2x32xf32> -> vector<2x72xf32>
    %c0_22 = arith.constant 0 : index
    %c0_23 = arith.constant 0 : index
    %32 = vector.load %arg8[%c0_22, %c0_23] : memref<72x32xf32, #tpu.memory_space<vmem>>, vector<72x32xf32>
    %cst_24 = arith.constant dense<0.000000e+00> : vector<2x32xf32>
    %33 = tpu.matmul %31, %32, %cst_24 {dimension_numbers = #tpu.dot_dimension_numbers<[1], [0], [0], [1], [0, 0, 1, 1], [], []>} : vector<2x72xf32>, vector<72x32xf32>, vector<2x32xf32> -> vector<2x32xf32>
    %c0_25 = arith.constant 0 : index
    %c0_26 = arith.constant 0 : index
    %34 = vector.load %arg9[%c0_25, %c0_26] : memref<1x32xf32, #tpu.memory_space<vmem>>, vector<1x32xf32>
    %35 = vector.broadcast %34 : vector<1x32xf32> to vector<2x32xf32>
    %36 = arith.addf %33, %35 : vector<2x32xf32>
    %cst_27 = arith.constant 0.000000e+00 : f32
    %37 = vector.broadcast %cst_27 : f32 to vector<2x32xf32>
    %38 = arith.maximumf %36, %37 : vector<2x32xf32>
    %c0_28 = arith.constant 0 : index
    %c0_29 = arith.constant 0 : index
    %39 = vector.load %arg10[%c0_28, %c0_29] : memref<32x128xf32, #tpu.memory_space<vmem>>, vector<32x128xf32>
    %cst_30 = arith.constant dense<0.000000e+00> : vector<2x128xf32>
    %40 = tpu.matmul %38, %39, %cst_30 {dimension_numbers = #tpu.dot_dimension_numbers<[1], [0], [0], [1], [0, 0, 1, 1], [], []>} : vector<2x32xf32>, vector<32x128xf32>, vector<2x128xf32> -> vector<2x128xf32>
    %c0_31 = arith.constant 0 : index
    %c0_32 = arith.constant 0 : index
    %41 = vector.load %arg11[%c0_31, %c0_32] : memref<1x128xf32, #tpu.memory_space<vmem>>, vector<1x128xf32>
    %42 = vector.broadcast %41 : vector<1x128xf32> to vector<2x128xf32>
    %43 = arith.addf %40, %42 : vector<2x128xf32>
    %c0_33 = arith.constant 0 : index
    %c0_34 = arith.constant 0 : index
    %44 = vector.load %arg12[%c0_33, %c0_34] : memref<2x128xf32, #tpu.memory_space<vmem>>, vector<2x128xf32>
    tpu.vector_store %arg12[%c0_33, %c0_34], %43 {strides = array<i32>} : memref<2x128xf32, #tpu.memory_space<vmem>>, vector<2x128xf32>,
    return
  }
}

</mosaic_0001>

<bundles_post_ra>
// kernel: tpu_custom_call.1
= control target key start
LH: loop header
LB: loop body
LE: loop exit
PB: predicated region body
PF: predicated region fallthrough
CT: control target
= control target key end

     0   :  { %17 = vsyncpa [#allocation3], 0  ;;  %s962_s0 = inlined_call_operand.hbm [shape: f32[16,32], index: 0, kind: input, shape index: {}]   ;;  %s963_s1 = inlined_call_operand.vmem [shape: f32[8,32], index: 1, kind: input, shape index: {}]   ;;  %s964_s2 = inlined_call_operand.vmem [shape: f32[2,7], index: 2, kind: input, shape index: {}]   ;;  %s965_s3 = inlined_call_operand.vmem [shape: f32[2,1], index: 3, kind: input, shape index: {}]   ;;  %s966_s4 = inlined_call_operand.vmem [shape: f32[32,32], index: 4, kind: input, shape index: {}]   ;;  %s967_s5 = inlined_call_operand.hbm [shape: f32[1,32], index: 5, kind: input, shape index: {}]   ;;  %s968_s6 = inlined_call_operand.vmem [shape: f32[32,32], index: 6, kind: input, shape index: {}]   ;;  %s969_s7 = inlined_call_operand.hbm [shape: f32[1,32], index: 7, kind: input, shape index: {}]   ;;  %s970_s8 = inlined_call_operand.vmem [shape: f32[72,32], index: 8, kind: input, shape index: {}]   ;;  %s971_s9 = inlined_call_operand.vmem [shape: f32[1,32], index: 9, kind: input, shape index: {}]   ;;  %s972_s10 = inlined_call_operand.vmem [shape: f32[32,128], index: 10, kind: input, shape index: {}]   ;;  %s973_s11 = inlined_call_operand.vmem [shape: f32[1,128], index: 11, kind: input, shape index: {}]   ;;  %s974_s12 = inlined_call_operand.hbm [shape: f32[2,128], index: 12, kind: output, shape index: {}]  }
   0x1   :  { %18 = vsyncpa [#allocation6], 0 }
   0x2   :  { %19 = vsyncpa [#allocation4], 0  ;;  %s729_s21 = smov [#allocation5]   ;;  %s730_s23 = smov [#allocation2]  }
   0x3   :  { %s46_s22 = sshll.u32 %s729_s21, 4  ;;  %s25_s24 = sshll.u32 %s730_s23, 4  ;;  %s47_s22 = int_to_ptr.vmem [resolvable:$true] %s46_s22  ;;  %s805_s24 = int_to_ptr.vmem [resolvable:$true] %s25_s24 }
   0x4   :  { %s635_s27 = scalar_lea.hbm %s967_s5, 16 }
   0x5   :  { %p636_p0 = scmp.ne.s32.totalorder %s967_s5, %s635_s27  ;;  %p639_p1 = scmp.lt.u32.totalorder %s635_s27, %s967_s5 }
   0x7   :  { %p641_p2 = pnand %p639_p1, %p636_p0 }
   0x9   :  { %644 = shalt.err (!%p641_p2)
}
   0xa   :  { %s645_s14 = scalar_lea.vmem %s47_s22, 16  ;;  %s649_s15 = scalar_lea.vmem %s47_s22, 32 }
   0xb   :  { %p646_p3 = scmp.ne.s32.totalorder %s47_s22, %s645_s14  ;;  %p650_p4 = scmp.lt.s32.totalorder %s47_s22, %s47_s22 }
   0xc   :  { %p651_p5 = scmp.lt.s32.totalorder %s649_s15, %s645_s14 }
   0xe   :  { %p652_p6 = por %p651_p5, %p650_p4 }
  0x10   :  { %p653_p7 = pnand %p652_p6, %p646_p3 }
  0x12   :  { %656 = shalt.err (!%p653_p7)
}
  0x13   :  { %49 = dma.hbm_to_vmem [thread:$0]  %s967_s5, 16, %s47_s22, [#allocation6]  }
  0x14   :  { %s657_s20 = scalar_lea.hbm %s962_s0, 256 }
  0x15   :  { %p658_p8 = scmp.ne.s32.totalorder %s962_s0, %s657_s20  ;;  %p661_p9 = scmp.lt.u32.totalorder %s657_s20, %s962_s0 }
  0x17   :  { %p663_p10 = pnand %p661_p9, %p658_p8 }
  0x19   :  { %666 = shalt.err (!%p663_p10)
}
  0x1a   :  { %s667_s27 = scalar_lea.vmem %s805_s24, 256  ;;  %p672_p12 = scmp.lt.s32.totalorder %s805_s24, %s805_s24 }
  0x1b   :  { %p668_p11 = scmp.ne.s32.totalorder %s805_s24, %s667_s27  ;;  %p673_p13 = scmp.lt.s32.totalorder %s667_s27, %s667_s27 }
  0x1d   :  { %p674_p0 = por %p673_p13, %p672_p12 }
  0x1f   :  { %p675_p1 = pnand %p674_p0, %p668_p11 }
  0x21   :  { %678 = shalt.err (!%p675_p1)
}
  0x22   :  { %s731_s5 = smov 128   ;;  %s732_s22 = smov 8  }
  0x23   :  { %31 = dma.hbm_to_vmem [thread:$0]  %s962_s0, 256, %s805_s24, [#allocation3], %s731_s5, %s731_s5, %s732_s22  }
  0x24   :  { %s733_s30 = smov [#allocation7]   ;;  %s679_s16 = scalar_lea.hbm %s969_s7, 16 }
  0x25   :  { %s58_s13 = sshll.u32 %s733_s30, 4  ;;  %p680_p2 = scmp.ne.s32.totalorder %s969_s7, %s679_s16  ;;  %s59_s13 = int_to_ptr.vmem [resolvable:$true] %s58_s13 }
  0x26   :  { %p683_p3 = scmp.lt.u32.totalorder %s679_s16, %s969_s7 }
  0x28   :  { %p685_p4 = pnand %p683_p3, %p680_p2 }
  0x2a   :  { %688 = shalt.err (!%p685_p4)
}
  0x2b   :  { %s689_s21 = scalar_lea.vmem %s59_s13, 16  ;;  %s693_s0 = scalar_lea.vmem %s59_s13, 32 }
  0x2c   :  { %p690_p5 = scmp.ne.s32.totalorder %s59_s13, %s689_s21  ;;  %p694_p6 = scmp.lt.s32.totalorder %s59_s13, %s59_s13 }
  0x2d   :  { %p695_p7 = scmp.lt.s32.totalorder %s693_s0, %s689_s21 }
  0x2f   :  { %p696_p8 = por %p695_p7, %p694_p6 }
  0x31   :  { %p697_p9 = pnand %p696_p8, %p690_p5 }
  0x33   :  { %700 = shalt.err (!%p697_p9)
}
  0x34   :  { %61 = dma.hbm_to_vmem [thread:$0]  %s969_s7, 16, %s59_s13, [#allocation6]  }
  0x35   :  { %723 = dma.done.wait [#allocation3], 256  }
  0x36   :  { %724 = vsyncadd [#allocation3], 4294967040 }
  0x37   :  { %725 = dma.done.wait [#allocation6], 32  }
  0x38   :  { %726 = vsyncadd [#allocation6], 4294967264  ;;  %v734_v0 = vmov 0.0|0.0   ;;  %vm735_vm0 = vmmov 0   ;;  %v736_v1 = vmov 0.0   ;;  %vm92_vm1 = vcmask 261120  }
  0x39   :  { %604 = vmatprep.subr.bf16.mxu0 %v734_v0  ;;  %576 = vmatprep.mubr.msk.f32.mxu0 %vm735_vm0, %v736_v1  ;;  %v81_v2 = vld [vmem:[%s966_s4] sm:$0xff]  ;;  %v82_v3 = vld [vmem:[%s966_s4 + $0x8] sm:$0xff]  ;;  %v83_v4 = vld [vmem:[%s966_s4 + $0x10] sm:$0xff]  ;;  %vm303_vm4 = vcmask 56320   ;;  %vm305_vm5 = vcmask 64512   ;;  %vm307_vm6 = vcmask 326656  }
  0x3a   :  { %v590_v5 = vpack.c.bf16 %v82_v3, %v81_v2  ;;  %v84_v6 = vld [vmem:[%s966_s4 + $0x18] sm:$0xff]  ;;  %v79_v7 = vld [vmem:[#allocation2] sm:$0xff]  ;;  %v178_v10 = vld [vmem:[%s968_s6 + $0x8] sm:$0xff]  ;;  %vm325_vm7 = vcmask 588800   ;;  %s739_s5 = smov [#allocation8]  }
  0x3b   :  { %v594_v8 = vpack.c.bf16 %v84_v6, %v83_v4  ;;  %544 = vmatprep.mubr.msk.f32.mxu1 %vm92_vm1, %v79_v7  ;;  %v177_v9 = vld [vmem:[%s968_s6] sm:$0xff]  ;;  %v80_v11 = vld [vmem:[#allocation2 + $0x8] sm:$0xff]  ;;  %v179_v13 = vld [vmem:[%s968_s6 + $0x10] sm:$0xff]  ;;  %s491_s7 = sshll.u32 %s739_s5, 4  ;;  %s492_s7 = int_to_ptr.vmem [resolvable:$true] %s491_s7 }
  0x3c   :  { %591 = vmatprep.subr.bf16.mxu1 %v590_v5  ;;  %v599_v12 = vpack.c.bf16 %v178_v10, %v177_v9  ;;  %v180_v14 = vld [vmem:[%s968_s6 + $0x18] sm:$0xff]  ;;  %v176_v16 = vld [vmem:[%s963_s1] sm:$0xff]  ;;  %s737_s1 = smov 7   ;;  %v310_v24 = vld [vmem:[%s970_s8 + $0x8] sm:$0xff]  ;;  %p706_p11 = scmp.lt.s32.totalorder %s492_s7, %s492_s7 }
  0x3d   :  { %593 = vmatpush3.bf16.msra.mxu1 %v590_v5  ;;  %v602_v15 = vpack.c.bf16 %v180_v14, %v179_v13  ;;  %v283_v17 = vld [vmem:[%s965_s3] sm:$0x3]  ;;  %v311_v25 = vld [vmem:[%s970_s8 + $0x10] sm:$0xff]  ;;  %v312_v27 = vld [vmem:[%s970_s8 + $0x18] sm:$0xff] }
  0x3e   :  { %595 = vmatprep.subr.bf16.mxu1 %v594_v8  ;;  %633 = vrsqrt.f32 %v283_v17  ;;  %vm286_vm2 = vcmp.eq.f32.partialorder %v283_v17, inf  ;;  %vm288_vm3 = vcmp.eq.f32.partialorder %v283_v17, 0.0  ;;  %v289_v20 = vand.u32 2147483648, %v283_v17  ;;  %v309_v23 = vld [vmem:[%s970_s8] sm:$0xff]  ;;  %v314_v30 = vld [vmem:[%s970_s8 + $0x28] sm:$0xff]  ;;  %v315_v44 = vld [vmem:[%s970_s8 + $0x30] sm:$0xff] }
  0x3f   :  { %v605_v26 = vpack.c.bf16 %v310_v24, %v309_v23  ;;  %v608_v28 = vpack.c.bf16 %v312_v27, %v311_v25  ;;  %v313_v29 = vld [vmem:[%s970_s8 + $0x20] sm:$0xff]  ;;  %v501_v32 = vld [vmem:[#allocation5] ss:$0 sm:$0xff]  ;;  %v504_v41 = vld [vmem:[#allocation7] ss:$0 sm:$0xff] }
  0x40   :  { %v611_v31 = vpack.c.bf16 %v314_v30, %v313_v29  ;;  %v316_v45 = vld [vmem:[%s970_s8 + $0x38] sm:$0xff]  ;;  %v317_v55 = vld [vmem:[%s970_s8 + $0x40] sm:$0xff]  ;;  %v401_v59 = vld [vmem:[%s972_s10 + $0x8] sm:$0xff]  ;;  %s738_s8 = smov 40  }
  0x41   :  { %597 = vmatpush3.bf16.msra.mxu1 %v594_v8  ;;  %606 = vmatpush3.bf16.msra.mxu0 %v605_v26  ;;  %v614_v49 = vpack.c.bf16 %v316_v45, %v315_v44  ;;  %v400_v58 = vld [vmem:[%s972_s10] sm:$0xff]  ;;  %v403_v13 = vld [vmem:[%s972_s10 + $0x18] sm:$0xff] }
  0x42   :  { %598 = vmatprep.subr.bf16.mxu1 %v734_v0  ;;  %607 = vmatprep.subr.bf16.mxu0 %v734_v0  ;;  %v617_v61 = vpack.c.bf16 %v401_v59, %v400_v58  ;;  %v282_v7 = vld [vmem:[%s964_s2] sm:$0x3] }
  0x44   :  { %545 = vmatmul.mubr.msk.f32.vlgmr.msra.gmra.mrb[0].mxu1 %vm92_vm1, %v80_v11 }
  0x45   :  { %600 = vmatpush3.bf16.msra.mxu1 %v599_v12  ;;  %555 = vmatprep.mubr.msk.f32.mxu1 %vm735_vm0, %v736_v1  ;;  %v402_v12 = vld [vmem:[%s972_s10 + $0x10] sm:$0xff]  ;;  %s701_s10 = scalar_lea.vmem %s492_s7, 32 }
  0x46   :  { %601 = vmatprep.subr.bf16.mxu1 %v734_v0  ;;  %609 = vmatpush3.bf16.msra.mxu0 %v608_v28  ;;  %v620_v14 = vpack.c.bf16 %v403_v13, %v402_v12  ;;  %p702_p10 = scmp.ne.s32.totalorder %s492_s7, %s701_s10  ;;  %p707_p12 = scmp.lt.s32.totalorder %s701_s10, %s701_s10 }
  0x47   :  { %610 = vmatprep.subr.bf16.mxu0 %v734_v0 }
  0x48   :  { %v634_v18 = vpop.eup %633  ;;  %p708_p13 = por %p707_p12, %p706_p11 }
  0x49   :  { %603 = vmatpush3.bf16.msra.mxu1 %v602_v15  ;;  %v285_v19 = vmul.f32 %v634_v18, %v283_v17  ;;  %v506_v15 = vld [vmem:[%s971_s9] ss:$0 sm:$0xff] }
  0x4a   :  { %616 = vmatprep.subr.bf16.mxu1 %v734_v0  ;;  %612 = vmatpush3.bf16.msra.mxu0 %v611_v31  ;;  %p709_p0 = pnand %p708_p13, %p702_p10 }
  0x4b   :  { %v287_v21 = vsel %vm286_vm2, %v283_v17, %v285_v19  ;;  %613 = vmatprep.subr.bf16.mxu0 %v734_v0 }
  0x4c   :  { %556 = vmatmul.mubr.msk.f32.vlgmr.msra.gmra.mrb[2].mxu1 %vm92_vm1, %v176_v16  ;;  %v290_v22 = vsel %vm288_vm3, %v289_v20, %v287_v21  ;;  %v508_v20 = vld [vmem:[%s973_s11] ss:$0 sm:$0xff] }
  0x4d   :  { %587 = vmatprep.mubr.msk.f32.mxu1 %vm735_vm0, %v736_v1  ;;  %292 = vrot.lane.b32.xlu0 %v290_v22, %s737_s1 }
  0x4e   :  { %615 = vmatpush3.bf16.msra.mxu0 %v614_v49  ;;  %618 = vmatpush3.bf16.msra.mxu1 %v617_v61 }
  0x4f   :  { %574 = vmatprep.subr.mxu0 %v736_v1  ;;  %619 = vmatprep.subr.bf16.mxu1 %v734_v0 }
  0x52   :  { %575 = vmatpush3.msra.mxu0 %v317_v55  ;;  %621 = vmatpush3.bf16.msra.mxu1 %v620_v14 }
  0xbf   :  { %v293_v6 = vpop.permute.xlu0 %292 }
  0xc0   :  { %v304_v8 = vsel %vm303_vm4, %v282_v7, %v293_v6 }
 0x117   :  { %v546_v33 = vpop.f32.mrb[0].mxu1 }
 0x118   :  { %v171_v34 = vadd.f32 %v546_v33, %v501_v32  ;;  %v165_v35 = vpop.f32.mrb[1].mxu1 }
 0x119   :  { %v166_v36 = vadd.f32 %v501_v32, %v165_v35 }
 0x11a   :  { %v175_v37 = vmax.f32 %v171_v34, 0.0 }
 0x11b   :  { %v174_v38 = vmax.f32 %v166_v36, 0.0 }
 0x11c   :  { %v263_v39 = vsel %vm92_vm1, %v175_v37, 0.0 }
 0x11d   :  { %v262_v40 = vsel %vm92_vm1, %v174_v38, 0.0 }
 0x11e   :  { %v264_v42 = vadd.f32 %v263_v39, %v262_v40 }
 0x11f   :  { %v257_v43 = vpop.f32.mrb[2].mxu1 }
 0x120   :  { %v265_v46 = vrot.slane %v264_v42, 4  ;;  %v258_v47 = vadd.f32 %v504_v41, %v257_v43  ;;  %v557_v48 = vpop.f32.mrb[3].mxu1 }
 0x122   :  { %v261_v50 = vmax.f32 %v258_v47, 0.0  ;;  %v266_v51 = vadd.f32 %v265_v46, %v264_v42 }
 0x124   :  { %v273_v52 = vsel %vm92_vm1, %v261_v50, 0.0  ;;  %v267_v53 = vrot.slane %v266_v51, 2 }
 0x125   :  { %v274_v54 = vrot.slane %v273_v52, 4 }
 0x126   :  { %v268_v56 = vadd.f32 %v267_v53, %v266_v51 }
 0x127   :  { %v275_v57 = vadd.f32 %v274_v54, %v273_v52 }
 0x128   :  { %v269_v60 = vrot.slane %v268_v56, 1 }
 0x129   :  { %v276_v62 = vrot.slane %v275_v57, 2 }
 0x12a   :  { %v270_v63 = vadd.f32 %v269_v60, %v268_v56 }
 0x12b   :  { %v277_v1 = vadd.f32 %v276_v62, %v275_v57 }
 0x12c   :  { %v272_v2 = vmul.f32 0.0625, %v270_v63 }
 0x12d   :  { %v278_v3 = vrot.slane %v277_v1, 1 }
 0x12e   :  { %296 = vrot.lane.b32.xlu0 %v272_v2, %s732_s22 }
 0x12f   :  { %v279_v4 = vadd.f32 %v278_v3, %v277_v1 }
 0x131   :  { %v281_v5 = vmul.f32 0.125, %v279_v4 }
 0x133   :  { %300 = vrot.lane.b32.xlu1 %v281_v5, %s738_s8 }
 0x1a0   :  { %v297_v9 = vpop.permute.xlu0 %296 }
 0x1a1   :  { %v306_v0 = vsel %vm305_vm5, %v304_v8, %v297_v9 }
 0x1a5   :  { %v301_v10 = vpop.permute.xlu1 %300 }
 0x1a6   :  { %v308_v11 = vsel %vm307_vm6, %v306_v0, %v301_v10 }
 0x1a7   :  { %577 = vmatmul.mubr.msk.f32.vlgmr.msra.gmra.mrb[0].mxu0 %vm325_vm7, %v308_v11 }
 0x27a   :  { %v395_v16 = vpop.f32.mrb[0].mxu0 }
 0x27b   :  { %v396_v17 = vadd.f32 %v506_v15, %v395_v16  ;;  %v578_v18 = vpop.f32.mrb[1].mxu0 }
 0x27d   :  { %v399_v19 = vmax.f32 %v396_v17, 0.0 }
 0x27f   :  { %588 = vmatmul.mubr.msk.f32.vlgmr.msra.gmra.mrb[4].mxu1 %vm92_vm1, %v399_v19 }
 0x352   :  { %v480_v21 = vpop.f32.mrb[4].mxu1 }
 0x353   :  { %v481_v22 = vadd.f32 %v508_v20, %v480_v21  ;;  %v589_v23 = vpop.f32.mrb[5].mxu1 }
 0x355   :  { %484 = vst [vmem:[#allocation8] sm:$0x3] %v481_v22 }
 0x356   :  { %712 = shalt.err (!%p709_p0)
}
 0x357   :  { %s713_s29 = scalar_lea.hbm %s974_s12, 32 }
 0x358   :  { %p714_p1 = scmp.ne.s32.totalorder %s974_s12, %s713_s29  ;;  %p717_p2 = scmp.lt.u32.totalorder %s713_s29, %s974_s12 }
 0x35a   :  { %p719_p3 = pnand %p717_p2, %p714_p1 }
 0x35c   :  { %722 = shalt.err (!%p719_p3)
}
 0x35d   :  { %494 = dma.vmem_to_hbm [thread:$0]  %s492_s7, 32, %s974_s12, [#allocation4]  }
 0x35e   :  { %727 = dma.done.wait [#allocation4], 32  }
 0x35f   :  { %728 = vsyncadd [#allocation4], 4294967264 }
 0x360   :  { %498 = vsyncpa [#allocation3], 1 }
 0x361   :  { %499 = vsyncpa [#allocation6], 1 }
 0x362   :  { %500 = vsyncpa [#allocation4], 1 }

</bundles_post_ra>
